<compile_context>
chip_gen: v6e
topology: v6e:2x2x1
jax: 0.10.0
libtpu: 0.0.40
codegen_flags: <defaults>
</compile_context>

<pallas_src>
import functools

import numpy as np
import jax
import jax.numpy as jnp
from jax import lax
from jax.experimental import pallas as pl
from jax.experimental.pallas import tpu as pltpu

START_TAG = "<START>"
STOP_TAG = "<STOP>"

KP = 128            # padded tag dimension (one lane width)
NEG = -1.0e30       # padding value (far below any real score)
TB = 8              # time block: rows of backpointers / one-hot per (8,128) store
CH = 64             # max sublane chunk for the per-step prev-tag reduce
HOIST_ROWS = 64     # hoist trans_T into vregs when round_up(K,8) <= this (<= 8 vregs)
UNROLL_BLOCKS = 4   # fully unroll the time-block loop when num_blocks <= this


def _round_up(x, m):
    return ((x + m - 1) // m) * m


def crf_viterbi_kernel(feats_ref, trans_t_ref, stop_row_ref,
                       score_ref, onehot_ref, bptr_ref,
                       *, start_idx, num_tags):
    T, kp = feats_ref.shape
    prev_rows = trans_t_ref.shape[0]        # = round_up(num_tags, 8) <= KP
    lane = lax.broadcasted_iota(jnp.int32, (1, kp), 1)   # tag index along lanes

    # Per-chunk constants + (optionally) the transition rows themselves, hoisted
    # out of the time loop. Padded prev rows sit at ~NEG so they can never win.
    hoist = prev_rows <= HOIST_ROWS
    chunks = []
    for lo in range(0, prev_rows, CH):
        ch = min(CH, prev_rows - lo)
        sub = lax.broadcasted_iota(jnp.int32, (ch, kp), 0) + lo        # prev index
        diag = sub == lax.broadcasted_iota(jnp.int32, (ch, kp), 1)     # lane == prev
        tr = trans_t_ref[pl.ds(lo, ch), :] if hoist else None
        chunks.append((lo, ch, sub, diag, tr))

    # init forward_var (1,KP): -10000 everywhere, 0 at START, NEG on padding lanes.
    init = jnp.where(lane == start_idx, 0.0, -10000.0)
    fv0 = jnp.where(lane < num_tags, init, NEG).astype(jnp.float32)

    def viterbi_step(fv, feat_row):
        best_val = None
        best_idx = None
        for lo, ch, sub, diag, tr in chunks:
            if tr is None:                                 # large-K fallback
                tr = trans_t_ref[pl.ds(lo, ch), :]
            # lane->sublane flip of fv[lo:lo+ch] via a masked lane-reduce
            fv_col = jnp.max(jnp.where(diag, fv, -jnp.inf), axis=1, keepdims=True)
            scores = tr + fv_col                           # [prev, next]
            vmax = jnp.max(scores, axis=0, keepdims=True)  # (1, KP)
            # first-occurrence argmax over prev (matches torch/numpy tie-break)
            bp = jnp.min(jnp.where(scores == vmax, sub, kp),
                         axis=0, keepdims=True).astype(jnp.int32)
            if best_val is None:
                best_val, best_idx = vmax, bp
            else:
                best_idx = jnp.where(vmax > best_val, bp, best_idx)
                best_val = jnp.maximum(best_val, vmax)
        # clamp so padding lanes stay pinned at NEG instead of drifting toward -inf
        fv_new = jnp.maximum(best_val + feat_row, NEG)
        return fv_new, best_idx

    nb = T // TB
    rem = T - nb * TB

    # ---- forward Viterbi sweep: TB rows per block, one (TB,KP) bptr store ----
    def fwd_block(t0, fv):
        feat_block = feats_ref[pl.ds(t0, TB), :]
        rows = []
        for i in range(TB):                                # statically unrolled
            fv, bp = viterbi_step(fv, feat_block[i:i + 1, :])
            rows.append(bp)
        bptr_ref[pl.ds(t0, TB), :] = jnp.concatenate(rows, axis=0)
        return fv

    fv = fv0
    if nb > 0:
        if nb <= UNROLL_BLOCKS:                            # full unroll for short T
            for b in range(nb):
                fv = fwd_block(b * TB, fv)
        else:
            fv = lax.fori_loop(
                0, nb, lambda b, c: fwd_block(pl.multiple_of(b * TB, TB), c), fv)
    for j in range(rem):                                   # static remainder rows
        t = nb * TB + j
        fv, bp = viterbi_step(fv, feats_ref[pl.ds(t, 1), :])
        bptr_ref[pl.ds(t, 1), :] = bp

    # ---- terminal step ----
    terminal = fv + stop_row_ref[...]                      # (1, KP)
    tmax = jnp.max(terminal, axis=1, keepdims=True)        # (1, 1) == terminal[best]
    best = jnp.min(jnp.where(terminal == tmax, lane, kp),
                   axis=1, keepdims=True).astype(jnp.int32)
    score_ref[...] = tmax
    m = (lane == best).astype(jnp.int32)                   # one-hot of best last tag

    # TODO(synk): the PyTorch code asserts the backtraced start tag == START_TAG;
    # a data-dependent Python assert has no in-kernel equivalent and is omitted.

    def backstep(msk, bp_row):
        nxt = jnp.max(jnp.where(msk == 1, bp_row, 0), axis=1, keepdims=True)
        return (lane == nxt).astype(jnp.int32)

    # ---- backtrace: static remainder (highest t) first, then TB-row blocks ----
    for j in range(rem):
        t = T - 1 - j
        onehot_ref[pl.ds(t, 1), :] = m.astype(jnp.float32)
        m = backstep(m, bptr_ref[pl.ds(t, 1), :])

    def bwd_block(t0, msk):
        bp_block = bptr_ref[pl.ds(t0, TB), :]
        rows = [None] * TB
        for i in range(TB - 1, -1, -1):                    # statically unrolled
            rows[i] = msk
            msk = backstep(msk, bp_block[i:i + 1, :])
        onehot_ref[pl.ds(t0, TB), :] = jnp.concatenate(rows, axis=0).astype(jnp.float32)
        return msk

    if nb > 0:
        if nb <= UNROLL_BLOCKS:
            for b in range(nb - 1, -1, -1):
                m = bwd_block(b * TB, m)
        else:
            m = lax.fori_loop(
                0, nb,
                lambda br, c: bwd_block(pl.multiple_of((nb - 1 - br) * TB, TB), c), m)


class CRFPallas:
    """Pallas/TPU reimplementation of the PyTorch CRF module's forward()."""

    def __init__(self, tag_to_ix, key):
        self.tag_to_ix = dict(tag_to_ix)
        self.tag_to_ix[START_TAG] = len(tag_to_ix)
        self.tag_to_ix[STOP_TAG] = len(tag_to_ix) + 1
        self.tagset_size = len(self.tag_to_ix)
        K = self.tagset_size
        assert K <= KP
        # deterministic synthetic init mirroring nn.Parameter(torch.randn(K, K))
        trans = jax.random.normal(key, (K, K), dtype=jnp.float32)
        trans = trans.at[self.tag_to_ix[START_TAG], :].set(-10000.0)
        trans = trans.at[:, self.tag_to_ix[STOP_TAG]].set(-10000.0)
        self.transitions = trans

    def __call__(self, x):
        T, K = x.shape
        assert K == self.tagset_size
        prev_rows = min(_round_up(K, 8), KP)

        feats_p = jnp.full((T, KP), NEG, jnp.float32).at[:, :K].set(
            x.astype(jnp.float32))
        # transitions pre-transposed ONCE outside the kernel, and shrunk to the
        # prev-rows that can actually win: trans_t[prev, next].
        trans_t_p = jnp.full((prev_rows, KP), NEG, jnp.float32).at[:K, :K].set(
            self.transitions.T)
        stop_row_p = jnp.full((1, KP), NEG, jnp.float32).at[0, :K].set(
            self.transitions[self.tag_to_ix[STOP_TAG], :])

        kernel = functools.partial(
            crf_viterbi_kernel,
            start_idx=self.tag_to_ix[START_TAG],
            num_tags=K)

        score, onehot = pl.pallas_call(
            kernel,
            out_shape=(jax.ShapeDtypeStruct((1, 1), jnp.float32),
                       jax.ShapeDtypeStruct((T, KP), jnp.float32)),
            in_specs=[pl.BlockSpec(memory_space=pltpu.MemorySpace.VMEM),
                      pl.BlockSpec(memory_space=pltpu.MemorySpace.VMEM),
                      pl.BlockSpec(memory_space=pltpu.MemorySpace.VMEM)],
            out_specs=(pl.BlockSpec(memory_space=pltpu.MemorySpace.VMEM),
                       pl.BlockSpec(memory_space=pltpu.MemorySpace.VMEM)),
            scratch_shapes=[pltpu.VMEM((T, KP), jnp.int32)],   # backpointers
        )(feats_p, trans_t_p, stop_row_p)
        return score[0, 0], onehot[:, :K]


def viterbi_ref(feats, trans, start, stop):
    """Pure numpy reference with identical semantics to CRF._viterbi_decode."""
    T, K = feats.shape
    fv = np.full(K, -10000.0, np.float32)
    fv[start] = 0.0
    bptrs = []
    for t in range(T):
        scores = trans + fv[None, :]            # [next, prev]
        bptrs.append(scores.argmax(axis=1))
        fv = scores.max(axis=1) + feats[t]
    terminal = fv + trans[stop]
    best = int(terminal.argmax())
    score = float(terminal[best])
    path = [best]
    for bp in reversed(bptrs):
        best = int(bp[best])
        path.append(best)
    path.pop()            # drop START
    path.reverse()
    onehot = np.zeros((T, K), np.float32)
    onehot[np.arange(T), path] = 1.0
    return score, onehot


if __name__ == "__main__":
    key = jax.random.PRNGKey(0)

    def run_case(user_tags, T, case_key):
        k_trans, k_feats = jax.random.split(case_key)
        tag_to_ix = {t: i for i, t in enumerate(user_tags)}
        crf = CRFPallas(tag_to_ix, k_trans)
        x = jax.random.normal(k_feats, (T, crf.tagset_size), dtype=jnp.float32)
        score, onehot = crf(x)
        jax.block_until_ready((score, onehot))
        ref_score, ref_onehot = viterbi_ref(
            np.asarray(x), np.asarray(crf.transitions),
            crf.tag_to_ix[START_TAG], crf.tag_to_ix[STOP_TAG])
        assert np.allclose(float(score), ref_score, rtol=1e-5, atol=1e-4), \
            (float(score), ref_score)
        assert np.array_equal(np.asarray(onehot), ref_onehot)

    k1, k2 = jax.random.split(key)
    # small case (K=7 tags incl. START/STOP, T multiple of the 8-row time block)
    run_case(["B", "I", "O", "X", "Y"], T=8, case_key=k1)
    # larger tagset + ragged T (exercises the remainder path and >8 prev rows)
    run_case([f"t{i}" for i in range(18)], T=13, case_key=k2)

    print("KERNEL_OK")
</pallas_src>

<mosaic_0001>
module attributes {stable_mosaic.version = 11 : i64} {
  func.func @crf_viterbi_kernel(%arg0: memref<8x128xf32, #tpu.memory_space<vmem>>, %arg1: memref<8x128xf32, #tpu.memory_space<vmem>>, %arg2: memref<1x128xf32, #tpu.memory_space<vmem>>, %arg3: memref<1x1xf32, #tpu.memory_space<vmem>>, %arg4: memref<8x128xf32, #tpu.memory_space<vmem>>, %arg5: memref<8x128xi32, #tpu.memory_space<vmem>>) attributes {dimension_semantics = [], scalar_prefetch = 0 : i64, scratch_operands = 1 : i64, tpu.core_type = #tpu.core_type<tc>} {
    %0 = tpu.iota {dimensions = array<i32: 1>} : vector<1x128xi32>
    %1 = tpu.iota {dimensions = array<i32: 0>} : vector<8x128xi32>
    %c0_i32 = arith.constant 0 : i32
    %2 = vector.broadcast %c0_i32 : i32 to vector<8x128xi32>
    %3 = arith.addi %1, %2 : vector<8x128xi32>
    %4 = tpu.iota {dimensions = array<i32: 1>} : vector<8x128xi32>
    %5 = arith.cmpi eq, %3, %4 : vector<8x128xi32>
    %c0 = arith.constant 0 : index
    %c0_0 = arith.constant 0 : index
    %6 = vector.load %arg1[%c0, %c0_0] : memref<8x128xf32, #tpu.memory_space<vmem>>, vector<8x128xf32>
    %c5_i32 = arith.constant 5 : i32
    %7 = vector.broadcast %c5_i32 : i32 to vector<1x128xi32>
    %8 = arith.cmpi eq, %0, %7 : vector<1x128xi32>
    %cst = arith.constant 0.000000e+00 : f32
    %cst_1 = arith.constant -1.000000e+04 : f32
    %9 = vector.broadcast %cst : f32 to vector<1x128xf32>
    %10 = vector.broadcast %cst_1 : f32 to vector<1x128xf32>
    %11 = arith.select %8, %9, %10 : vector<1x128xi1>, vector<1x128xf32>
    %c7_i32 = arith.constant 7 : i32
    %12 = vector.broadcast %c7_i32 : i32 to vector<1x128xi32>
    %13 = arith.cmpi slt, %0, %12 : vector<1x128xi32>
    %cst_2 = arith.constant -1.000000e+30 : f32
    %14 = vector.broadcast %cst_2 : f32 to vector<1x128xf32>
    %15 = arith.select %13, %11, %14 : vector<1x128xi1>, vector<1x128xf32>
    %c0_3 = arith.constant 0 : index
    %c0_4 = arith.constant 0 : index
    %16 = vector.load %arg0[%c0_3, %c0_4] : memref<8x128xf32, #tpu.memory_space<vmem>>, vector<8x128xf32>
    %17 = vector.extract_strided_slice %16 {offsets = [0, 0], sizes = [1, 128], strides = [1, 1]} : vector<8x128xf32> to vector<1x128xf32>
    %cst_5 = arith.constant 0xFF800000 : f32
    %18 = vector.shape_cast %15 : vector<1x128xf32> to vector<1x128xf32>
    %19 = vector.broadcast %18 : vector<1x128xf32> to vector<8x128xf32>
    %20 = vector.broadcast %cst_5 : f32 to vector<8x128xf32>
    %21 = arith.select %5, %19, %20 : vector<8x128xi1>, vector<8x128xf32>
    %cst_6 = arith.constant dense<0xFF800000> : vector<8xf32>
    %22 = vector.multi_reduction <maximumf>, %21, %cst_6 [1] : vector<8x128xf32> to vector<8xf32>
    %23 = vector.shape_cast %22 : vector<8xf32> to vector<8x1xf32>
    %24 = vector.broadcast %23 : vector<8x1xf32> to vector<8x128xf32>
    %25 = arith.addf %6, %24 : vector<8x128xf32>
    %cst_7 = arith.constant dense<0xFF800000> : vector<128xf32>
    %26 = vector.multi_reduction <maximumf>, %25, %cst_7 [0] : vector<8x128xf32> to vector<128xf32>
    %27 = vector.shape_cast %26 : vector<128xf32> to vector<1x128xf32>
    %28 = vector.broadcast %27 : vector<1x128xf32> to vector<8x128xf32>
    %29 = arith.cmpf oeq, %25, %28 : vector<8x128xf32>
    %c128_i32 = arith.constant 128 : i32
    %30 = vector.broadcast %c128_i32 : i32 to vector<8x128xi32>
    %31 = arith.select %29, %3, %30 : vector<8x128xi1>, vector<8x128xi32>
    %cst_8 = arith.constant dense<2147483647> : vector<128xi32>
    %32 = vector.multi_reduction <minsi>, %31, %cst_8 [0] : vector<8x128xi32> to vector<128xi32>
    %33 = vector.shape_cast %32 : vector<128xi32> to vector<1x128xi32>
    %34 = arith.addf %27, %17 : vector<1x128xf32>
    %cst_9 = arith.constant -1.000000e+30 : f32
    %35 = vector.broadcast %cst_9 : f32 to vector<1x128xf32>
    %36 = arith.maximumf %34, %35 : vector<1x128xf32>
    %37 = vector.extract_strided_slice %16 {offsets = [1, 0], sizes = [1, 128], strides = [1, 1]} : vector<8x128xf32> to vector<1x128xf32>
    %cst_10 = arith.constant 0xFF800000 : f32
    %38 = vector.shape_cast %36 : vector<1x128xf32> to vector<1x128xf32>
    %39 = vector.broadcast %38 : vector<1x128xf32> to vector<8x128xf32>
    %40 = vector.broadcast %cst_10 : f32 to vector<8x128xf32>
    %41 = arith.select %5, %39, %40 : vector<8x128xi1>, vector<8x128xf32>
    %cst_11 = arith.constant dense<0xFF800000> : vector<8xf32>
    %42 = vector.multi_reduction <maximumf>, %41, %cst_11 [1] : vector<8x128xf32> to vector<8xf32>
    %43 = vector.shape_cast %42 : vector<8xf32> to vector<8x1xf32>
    %44 = vector.broadcast %43 : vector<8x1xf32> to vector<8x128xf32>
    %45 = arith.addf %6, %44 : vector<8x128xf32>
    %cst_12 = arith.constant dense<0xFF800000> : vector<128xf32>
    %46 = vector.multi_reduction <maximumf>, %45, %cst_12 [0] : vector<8x128xf32> to vector<128xf32>
    %47 = vector.shape_cast %46 : vector<128xf32> to vector<1x128xf32>
    %48 = vector.broadcast %47 : vector<1x128xf32> to vector<8x128xf32>
    %49 = arith.cmpf oeq, %45, %48 : vector<8x128xf32>
    %c128_i32_13 = arith.constant 128 : i32
    %50 = vector.broadcast %c128_i32_13 : i32 to vector<8x128xi32>
    %51 = arith.select %49, %3, %50 : vector<8x128xi1>, vector<8x128xi32>
    %cst_14 = arith.constant dense<2147483647> : vector<128xi32>
    %52 = vector.multi_reduction <minsi>, %51, %cst_14 [0] : vector<8x128xi32> to vector<128xi32>
    %53 = vector.shape_cast %52 : vector<128xi32> to vector<1x128xi32>
    %54 = arith.addf %47, %37 : vector<1x128xf32>
    %cst_15 = arith.constant -1.000000e+30 : f32
    %55 = vector.broadcast %cst_15 : f32 to vector<1x128xf32>
    %56 = arith.maximumf %54, %55 : vector<1x128xf32>
    %57 = vector.extract_strided_slice %16 {offsets = [2, 0], sizes = [1, 128], strides = [1, 1]} : vector<8x128xf32> to vector<1x128xf32>
    %cst_16 = arith.constant 0xFF800000 : f32
    %58 = vector.shape_cast %56 : vector<1x128xf32> to vector<1x128xf32>
    %59 = vector.broadcast %58 : vector<1x128xf32> to vector<8x128xf32>
    %60 = vector.broadcast %cst_16 : f32 to vector<8x128xf32>
    %61 = arith.select %5, %59, %60 : vector<8x128xi1>, vector<8x128xf32>
    %cst_17 = arith.constant dense<0xFF800000> : vector<8xf32>
    %62 = vector.multi_reduction <maximumf>, %61, %cst_17 [1] : vector<8x128xf32> to vector<8xf32>
    %63 = vector.shape_cast %62 : vector<8xf32> to vector<8x1xf32>
    %64 = vector.broadcast %63 : vector<8x1xf32> to vector<8x128xf32>
    %65 = arith.addf %6, %64 : vector<8x128xf32>
    %cst_18 = arith.constant dense<0xFF800000> : vector<128xf32>
    %66 = vector.multi_reduction <maximumf>, %65, %cst_18 [0] : vector<8x128xf32> to vector<128xf32>
    %67 = vector.shape_cast %66 : vector<128xf32> to vector<1x128xf32>
    %68 = vector.broadcast %67 : vector<1x128xf32> to vector<8x128xf32>
    %69 = arith.cmpf oeq, %65, %68 : vector<8x128xf32>
    %c128_i32_19 = arith.constant 128 : i32
    %70 = vector.broadcast %c128_i32_19 : i32 to vector<8x128xi32>
    %71 = arith.select %69, %3, %70 : vector<8x128xi1>, vector<8x128xi32>
    %cst_20 = arith.constant dense<2147483647> : vector<128xi32>
    %72 = vector.multi_reduction <minsi>, %71, %cst_20 [0] : vector<8x128xi32> to vector<128xi32>
    %73 = vector.shape_cast %72 : vector<128xi32> to vector<1x128xi32>
    %74 = arith.addf %67, %57 : vector<1x128xf32>
    %cst_21 = arith.constant -1.000000e+30 : f32
    %75 = vector.broadcast %cst_21 : f32 to vector<1x128xf32>
    %76 = arith.maximumf %74, %75 : vector<1x128xf32>
    %77 = vector.extract_strided_slice %16 {offsets = [3, 0], sizes = [1, 128], strides = [1, 1]} : vector<8x128xf32> to vector<1x128xf32>
    %cst_22 = arith.constant 0xFF800000 : f32
    %78 = vector.shape_cast %76 : vector<1x128xf32> to vector<1x128xf32>
    %79 = vector.broadcast %78 : vector<1x128xf32> to vector<8x128xf32>
    %80 = vector.broadcast %cst_22 : f32 to vector<8x128xf32>
    %81 = arith.select %5, %79, %80 : vector<8x128xi1>, vector<8x128xf32>
    %cst_23 = arith.constant dense<0xFF800000> : vector<8xf32>
    %82 = vector.multi_reduction <maximumf>, %81, %cst_23 [1] : vector<8x128xf32> to vector<8xf32>
    %83 = vector.shape_cast %82 : vector<8xf32> to vector<8x1xf32>
    %84 = vector.broadcast %83 : vector<8x1xf32> to vector<8x128xf32>
    %85 = arith.addf %6, %84 : vector<8x128xf32>
    %cst_24 = arith.constant dense<0xFF800000> : vector<128xf32>
    %86 = vector.multi_reduction <maximumf>, %85, %cst_24 [0] : vector<8x128xf32> to vector<128xf32>
    %87 = vector.shape_cast %86 : vector<128xf32> to vector<1x128xf32>
    %88 = vector.broadcast %87 : vector<1x128xf32> to vector<8x128xf32>
    %89 = arith.cmpf oeq, %85, %88 : vector<8x128xf32>
    %c128_i32_25 = arith.constant 128 : i32
    %90 = vector.broadcast %c128_i32_25 : i32 to vector<8x128xi32>
    %91 = arith.select %89, %3, %90 : vector<8x128xi1>, vector<8x128xi32>
    %cst_26 = arith.constant dense<2147483647> : vector<128xi32>
    %92 = vector.multi_reduction <minsi>, %91, %cst_26 [0] : vector<8x128xi32> to vector<128xi32>
    %93 = vector.shape_cast %92 : vector<128xi32> to vector<1x128xi32>
    %94 = arith.addf %87, %77 : vector<1x128xf32>
    %cst_27 = arith.constant -1.000000e+30 : f32
    %95 = vector.broadcast %cst_27 : f32 to vector<1x128xf32>
    %96 = arith.maximumf %94, %95 : vector<1x128xf32>
    %97 = vector.extract_strided_slice %16 {offsets = [4, 0], sizes = [1, 128], strides = [1, 1]} : vector<8x128xf32> to vector<1x128xf32>
    %cst_28 = arith.constant 0xFF800000 : f32
    %98 = vector.shape_cast %96 : vector<1x128xf32> to vector<1x128xf32>
    %99 = vector.broadcast %98 : vector<1x128xf32> to vector<8x128xf32>
    %100 = vector.broadcast %cst_28 : f32 to vector<8x128xf32>
    %101 = arith.select %5, %99, %100 : vector<8x128xi1>, vector<8x128xf32>
    %cst_29 = arith.constant dense<0xFF800000> : vector<8xf32>
    %102 = vector.multi_reduction <maximumf>, %101, %cst_29 [1] : vector<8x128xf32> to vector<8xf32>
    %103 = vector.shape_cast %102 : vector<8xf32> to vector<8x1xf32>
    %104 = vector.broadcast %103 : vector<8x1xf32> to vector<8x128xf32>
    %105 = arith.addf %6, %104 : vector<8x128xf32>
    %cst_30 = arith.constant dense<0xFF800000> : vector<128xf32>
    %106 = vector.multi_reduction <maximumf>, %105, %cst_30 [0] : vector<8x128xf32> to vector<128xf32>
    %107 = vector.shape_cast %106 : vector<128xf32> to vector<1x128xf32>
    %108 = vector.broadcast %107 : vector<1x128xf32> to vector<8x128xf32>
    %109 = arith.cmpf oeq, %105, %108 : vector<8x128xf32>
    %c128_i32_31 = arith.constant 128 : i32
    %110 = vector.broadcast %c128_i32_31 : i32 to vector<8x128xi32>
    %111 = arith.select %109, %3, %110 : vector<8x128xi1>, vector<8x128xi32>
    %cst_32 = arith.constant dense<2147483647> : vector<128xi32>
    %112 = vector.multi_reduction <minsi>, %111, %cst_32 [0] : vector<8x128xi32> to vector<128xi32>
    %113 = vector.shape_cast %112 : vector<128xi32> to vector<1x128xi32>
    %114 = arith.addf %107, %97 : vector<1x128xf32>
    %cst_33 = arith.constant -1.000000e+30 : f32
    %115 = vector.broadcast %cst_33 : f32 to vector<1x128xf32>
    %116 = arith.maximumf %114, %115 : vector<1x128xf32>
    %117 = vector.extract_strided_slice %16 {offsets = [5, 0], sizes = [1, 128], strides = [1, 1]} : vector<8x128xf32> to vector<1x128xf32>
    %cst_34 = arith.constant 0xFF800000 : f32
    %118 = vector.shape_cast %116 : vector<1x128xf32> to vector<1x128xf32>
    %119 = vector.broadcast %118 : vector<1x128xf32> to vector<8x128xf32>
    %120 = vector.broadcast %cst_34 : f32 to vector<8x128xf32>
    %121 = arith.select %5, %119, %120 : vector<8x128xi1>, vector<8x128xf32>
    %cst_35 = arith.constant dense<0xFF800000> : vector<8xf32>
    %122 = vector.multi_reduction <maximumf>, %121, %cst_35 [1] : vector<8x128xf32> to vector<8xf32>
    %123 = vector.shape_cast %122 : vector<8xf32> to vector<8x1xf32>
    %124 = vector.broadcast %123 : vector<8x1xf32> to vector<8x128xf32>
    %125 = arith.addf %6, %124 : vector<8x128xf32>
    %cst_36 = arith.constant dense<0xFF800000> : vector<128xf32>
    %126 = vector.multi_reduction <maximumf>, %125, %cst_36 [0] : vector<8x128xf32> to vector<128xf32>
    %127 = vector.shape_cast %126 : vector<128xf32> to vector<1x128xf32>
    %128 = vector.broadcast %127 : vector<1x128xf32> to vector<8x128xf32>
    %129 = arith.cmpf oeq, %125, %128 : vector<8x128xf32>
    %c128_i32_37 = arith.constant 128 : i32
    %130 = vector.broadcast %c128_i32_37 : i32 to vector<8x128xi32>
    %131 = arith.select %129, %3, %130 : vector<8x128xi1>, vector<8x128xi32>
    %cst_38 = arith.constant dense<2147483647> : vector<128xi32>
    %132 = vector.multi_reduction <minsi>, %131, %cst_38 [0] : vector<8x128xi32> to vector<128xi32>
    %133 = vector.shape_cast %132 : vector<128xi32> to vector<1x128xi32>
    %134 = arith.addf %127, %117 : vector<1x128xf32>
    %cst_39 = arith.constant -1.000000e+30 : f32
    %135 = vector.broadcast %cst_39 : f32 to vector<1x128xf32>
    %136 = arith.maximumf %134, %135 : vector<1x128xf32>
    %137 = vector.extract_strided_slice %16 {offsets = [6, 0], sizes = [1, 128], strides = [1, 1]} : vector<8x128xf32> to vector<1x128xf32>
    %cst_40 = arith.constant 0xFF800000 : f32
    %138 = vector.shape_cast %136 : vector<1x128xf32> to vector<1x128xf32>
    %139 = vector.broadcast %138 : vector<1x128xf32> to vector<8x128xf32>
    %140 = vector.broadcast %cst_40 : f32 to vector<8x128xf32>
    %141 = arith.select %5, %139, %140 : vector<8x128xi1>, vector<8x128xf32>
    %cst_41 = arith.constant dense<0xFF800000> : vector<8xf32>
    %142 = vector.multi_reduction <maximumf>, %141, %cst_41 [1] : vector<8x128xf32> to vector<8xf32>
    %143 = vector.shape_cast %142 : vector<8xf32> to vector<8x1xf32>
    %144 = vector.broadcast %143 : vector<8x1xf32> to vector<8x128xf32>
    %145 = arith.addf %6, %144 : vector<8x128xf32>
    %cst_42 = arith.constant dense<0xFF800000> : vector<128xf32>
    %146 = vector.multi_reduction <maximumf>, %145, %cst_42 [0] : vector<8x128xf32> to vector<128xf32>
    %147 = vector.shape_cast %146 : vector<128xf32> to vector<1x128xf32>
    %148 = vector.broadcast %147 : vector<1x128xf32> to vector<8x128xf32>
    %149 = arith.cmpf oeq, %145, %148 : vector<8x128xf32>
    %c128_i32_43 = arith.constant 128 : i32
    %150 = vector.broadcast %c128_i32_43 : i32 to vector<8x128xi32>
    %151 = arith.select %149, %3, %150 : vector<8x128xi1>, vector<8x128xi32>
    %cst_44 = arith.constant dense<2147483647> : vector<128xi32>
    %152 = vector.multi_reduction <minsi>, %151, %cst_44 [0] : vector<8x128xi32> to vector<128xi32>
    %153 = vector.shape_cast %152 : vector<128xi32> to vector<1x128xi32>
    %154 = arith.addf %147, %137 : vector<1x128xf32>
    %cst_45 = arith.constant -1.000000e+30 : f32
    %155 = vector.broadcast %cst_45 : f32 to vector<1x128xf32>
    %156 = arith.maximumf %154, %155 : vector<1x128xf32>
    %157 = vector.extract_strided_slice %16 {offsets = [7, 0], sizes = [1, 128], strides = [1, 1]} : vector<8x128xf32> to vector<1x128xf32>
    %cst_46 = arith.constant 0xFF800000 : f32
    %158 = vector.shape_cast %156 : vector<1x128xf32> to vector<1x128xf32>
    %159 = vector.broadcast %158 : vector<1x128xf32> to vector<8x128xf32>
    %160 = vector.broadcast %cst_46 : f32 to vector<8x128xf32>
    %161 = arith.select %5, %159, %160 : vector<8x128xi1>, vector<8x128xf32>
    %cst_47 = arith.constant dense<0xFF800000> : vector<8xf32>
    %162 = vector.multi_reduction <maximumf>, %161, %cst_47 [1] : vector<8x128xf32> to vector<8xf32>
    %163 = vector.shape_cast %162 : vector<8xf32> to vector<8x1xf32>
    %164 = vector.broadcast %163 : vector<8x1xf32> to vector<8x128xf32>
    %165 = arith.addf %6, %164 : vector<8x128xf32>
    %cst_48 = arith.constant dense<0xFF800000> : vector<128xf32>
    %166 = vector.multi_reduction <maximumf>, %165, %cst_48 [0] : vector<8x128xf32> to vector<128xf32>
    %167 = vector.shape_cast %166 : vector<128xf32> to vector<1x128xf32>
    %168 = vector.broadcast %167 : vector<1x128xf32> to vector<8x128xf32>
    %169 = arith.cmpf oeq, %165, %168 : vector<8x128xf32>
    %c128_i32_49 = arith.constant 128 : i32
    %170 = vector.broadcast %c128_i32_49 : i32 to vector<8x128xi32>
    %171 = arith.select %169, %3, %170 : vector<8x128xi1>, vector<8x128xi32>
    %cst_50 = arith.constant dense<2147483647> : vector<128xi32>
    %172 = vector.multi_reduction <minsi>, %171, %cst_50 [0] : vector<8x128xi32> to vector<128xi32>
    %173 = vector.shape_cast %172 : vector<128xi32> to vector<1x128xi32>
    %174 = arith.addf %167, %157 : vector<1x128xf32>
    %cst_51 = arith.constant -1.000000e+30 : f32
    %175 = vector.broadcast %cst_51 : f32 to vector<1x128xf32>
    %176 = arith.maximumf %174, %175 : vector<1x128xf32>
    %177 = tpu.concatenate %33, %53, %73, %93, %113, %133, %153, %173 in 0 : vector<1x128xi32>, vector<1x128xi32>, vector<1x128xi32>, vector<1x128xi32>, vector<1x128xi32>, vector<1x128xi32>, vector<1x128xi32>, vector<1x128xi32> -> vector<8x128xi32>
    %c0_52 = arith.constant 0 : index
    %c0_53 = arith.constant 0 : index
    %178 = vector.load %arg5[%c0_52, %c0_53] : memref<8x128xi32, #tpu.memory_space<vmem>>, vector<8x128xi32>
    tpu.vector_store %arg5[%c0_52, %c0_53], %177 {strides = array<i32>} : memref<8x128xi32, #tpu.memory_space<vmem>>, vector<8x128xi32>,
    %c0_54 = arith.constant 0 : index
    %c0_55 = arith.constant 0 : index
    %179 = vector.load %arg2[%c0_54, %c0_55] : memref<1x128xf32, #tpu.memory_space<vmem>>, vector<1x128xf32>
    %180 = arith.addf %176, %179 : vector<1x128xf32>
    %cst_56 = arith.constant dense<0xFF800000> : vector<1xf32>
    %181 = vector.multi_reduction <maximumf>, %180, %cst_56 [1] : vector<1x128xf32> to vector<1xf32>
    %182 = vector.shape_cast %181 : vector<1xf32> to vector<1x1xf32>
    %183 = vector.broadcast %182 : vector<1x1xf32> to vector<1x128xf32>
    %184 = arith.cmpf oeq, %180, %183 : vector<1x128xf32>
    %c128_i32_57 = arith.constant 128 : i32
    %185 = vector.broadcast %c128_i32_57 : i32 to vector<1x128xi32>
    %186 = arith.select %184, %0, %185 : vector<1x128xi1>, vector<1x128xi32>
    %cst_58 = arith.constant dense<2147483647> : vector<1xi32>
    %187 = vector.multi_reduction <minsi>, %186, %cst_58 [1] : vector<1x128xi32> to vector<1xi32>
    %188 = vector.shape_cast %187 : vector<1xi32> to vector<1x1xi32>
    %c0_59 = arith.constant 0 : index
    %c0_60 = arith.constant 0 : index
    %189 = vector.load %arg3[%c0_59, %c0_60] : memref<1x1xf32, #tpu.memory_space<vmem>>, vector<1x1xf32>
    tpu.vector_store %arg3[%c0_59, %c0_60], %182 {strides = array<i32>} : memref<1x1xf32, #tpu.memory_space<vmem>>, vector<1x1xf32>,
    %190 = vector.broadcast %188 : vector<1x1xi32> to vector<1x128xi32>
    %191 = arith.cmpi eq, %0, %190 : vector<1x128xi32>
    %192 = arith.extui %191 : vector<1x128xi1> to vector<1x128xi32>
    %c0_61 = arith.constant 0 : index
    %c0_62 = arith.constant 0 : index
    %193 = vector.load %arg5[%c0_61, %c0_62] : memref<8x128xi32, #tpu.memory_space<vmem>>, vector<8x128xi32>
    %194 = vector.extract_strided_slice %193 {offsets = [7, 0], sizes = [1, 128], strides = [1, 1]} : vector<8x128xi32> to vector<1x128xi32>
    %c1_i32 = arith.constant 1 : i32
    %195 = vector.broadcast %c1_i32 : i32 to vector<1x128xi32>
    %196 = arith.cmpi eq, %192, %195 : vector<1x128xi32>
    %c0_i32_63 = arith.constant 0 : i32
    %197 = vector.broadcast %c0_i32_63 : i32 to vector<1x128xi32>
    %198 = arith.select %196, %194, %197 : vector<1x128xi1>, vector<1x128xi32>
    %cst_64 = arith.constant dense<-2147483648> : vector<1xi32>
    %199 = vector.multi_reduction <maxsi>, %198, %cst_64 [1] : vector<1x128xi32> to vector<1xi32>
    %200 = vector.shape_cast %199 : vector<1xi32> to vector<1x1xi32>
    %201 = vector.broadcast %200 : vector<1x1xi32> to vector<1x128xi32>
    %202 = arith.cmpi eq, %0, %201 : vector<1x128xi32>
    %203 = arith.extui %202 : vector<1x128xi1> to vector<1x128xi32>
    %204 = vector.extract_strided_slice %193 {offsets = [6, 0], sizes = [1, 128], strides = [1, 1]} : vector<8x128xi32> to vector<1x128xi32>
    %c1_i32_65 = arith.constant 1 : i32
    %205 = vector.broadcast %c1_i32_65 : i32 to vector<1x128xi32>
    %206 = arith.cmpi eq, %203, %205 : vector<1x128xi32>
    %c0_i32_66 = arith.constant 0 : i32
    %207 = vector.broadcast %c0_i32_66 : i32 to vector<1x128xi32>
    %208 = arith.select %206, %204, %207 : vector<1x128xi1>, vector<1x128xi32>
    %cst_67 = arith.constant dense<-2147483648> : vector<1xi32>
    %209 = vector.multi_reduction <maxsi>, %208, %cst_67 [1] : vector<1x128xi32> to vector<1xi32>
    %210 = vector.shape_cast %209 : vector<1xi32> to vector<1x1xi32>
    %211 = vector.broadcast %210 : vector<1x1xi32> to vector<1x128xi32>
    %212 = arith.cmpi eq, %0, %211 : vector<1x128xi32>
    %213 = arith.extui %212 : vector<1x128xi1> to vector<1x128xi32>
    %214 = vector.extract_strided_slice %193 {offsets = [5, 0], sizes = [1, 128], strides = [1, 1]} : vector<8x128xi32> to vector<1x128xi32>
    %c1_i32_68 = arith.constant 1 : i32
    %215 = vector.broadcast %c1_i32_68 : i32 to vector<1x128xi32>
    %216 = arith.cmpi eq, %213, %215 : vector<1x128xi32>
    %c0_i32_69 = arith.constant 0 : i32
    %217 = vector.broadcast %c0_i32_69 : i32 to vector<1x128xi32>
    %218 = arith.select %216, %214, %217 : vector<1x128xi1>, vector<1x128xi32>
    %cst_70 = arith.constant dense<-2147483648> : vector<1xi32>
    %219 = vector.multi_reduction <maxsi>, %218, %cst_70 [1] : vector<1x128xi32> to vector<1xi32>
    %220 = vector.shape_cast %219 : vector<1xi32> to vector<1x1xi32>
    %221 = vector.broadcast %220 : vector<1x1xi32> to vector<1x128xi32>
    %222 = arith.cmpi eq, %0, %221 : vector<1x128xi32>
    %223 = arith.extui %222 : vector<1x128xi1> to vector<1x128xi32>
    %224 = vector.extract_strided_slice %193 {offsets = [4, 0], sizes = [1, 128], strides = [1, 1]} : vector<8x128xi32> to vector<1x128xi32>
    %c1_i32_71 = arith.constant 1 : i32
    %225 = vector.broadcast %c1_i32_71 : i32 to vector<1x128xi32>
    %226 = arith.cmpi eq, %223, %225 : vector<1x128xi32>
    %c0_i32_72 = arith.constant 0 : i32
    %227 = vector.broadcast %c0_i32_72 : i32 to vector<1x128xi32>
    %228 = arith.select %226, %224, %227 : vector<1x128xi1>, vector<1x128xi32>
    %cst_73 = arith.constant dense<-2147483648> : vector<1xi32>
    %229 = vector.multi_reduction <maxsi>, %228, %cst_73 [1] : vector<1x128xi32> to vector<1xi32>
    %230 = vector.shape_cast %229 : vector<1xi32> to vector<1x1xi32>
    %231 = vector.broadcast %230 : vector<1x1xi32> to vector<1x128xi32>
    %232 = arith.cmpi eq, %0, %231 : vector<1x128xi32>
    %233 = arith.extui %232 : vector<1x128xi1> to vector<1x128xi32>
    %234 = vector.extract_strided_slice %193 {offsets = [3, 0], sizes = [1, 128], strides = [1, 1]} : vector<8x128xi32> to vector<1x128xi32>
    %c1_i32_74 = arith.constant 1 : i32
    %235 = vector.broadcast %c1_i32_74 : i32 to vector<1x128xi32>
    %236 = arith.cmpi eq, %233, %235 : vector<1x128xi32>
    %c0_i32_75 = arith.constant 0 : i32
    %237 = vector.broadcast %c0_i32_75 : i32 to vector<1x128xi32>
    %238 = arith.select %236, %234, %237 : vector<1x128xi1>, vector<1x128xi32>
    %cst_76 = arith.constant dense<-2147483648> : vector<1xi32>
    %239 = vector.multi_reduction <maxsi>, %238, %cst_76 [1] : vector<1x128xi32> to vector<1xi32>
    %240 = vector.shape_cast %239 : vector<1xi32> to vector<1x1xi32>
    %241 = vector.broadcast %240 : vector<1x1xi32> to vector<1x128xi32>
    %242 = arith.cmpi eq, %0, %241 : vector<1x128xi32>
    %243 = arith.extui %242 : vector<1x128xi1> to vector<1x128xi32>
    %244 = vector.extract_strided_slice %193 {offsets = [2, 0], sizes = [1, 128], strides = [1, 1]} : vector<8x128xi32> to vector<1x128xi32>
    %c1_i32_77 = arith.constant 1 : i32
    %245 = vector.broadcast %c1_i32_77 : i32 to vector<1x128xi32>
    %246 = arith.cmpi eq, %243, %245 : vector<1x128xi32>
    %c0_i32_78 = arith.constant 0 : i32
    %247 = vector.broadcast %c0_i32_78 : i32 to vector<1x128xi32>
    %248 = arith.select %246, %244, %247 : vector<1x128xi1>, vector<1x128xi32>
    %cst_79 = arith.constant dense<-2147483648> : vector<1xi32>
    %249 = vector.multi_reduction <maxsi>, %248, %cst_79 [1] : vector<1x128xi32> to vector<1xi32>
    %250 = vector.shape_cast %249 : vector<1xi32> to vector<1x1xi32>
    %251 = vector.broadcast %250 : vector<1x1xi32> to vector<1x128xi32>
    %252 = arith.cmpi eq, %0, %251 : vector<1x128xi32>
    %253 = arith.extui %252 : vector<1x128xi1> to vector<1x128xi32>
    %254 = vector.extract_strided_slice %193 {offsets = [1, 0], sizes = [1, 128], strides = [1, 1]} : vector<8x128xi32> to vector<1x128xi32>
    %c1_i32_80 = arith.constant 1 : i32
    %255 = vector.broadcast %c1_i32_80 : i32 to vector<1x128xi32>
    %256 = arith.cmpi eq, %253, %255 : vector<1x128xi32>
    %c0_i32_81 = arith.constant 0 : i32
    %257 = vector.broadcast %c0_i32_81 : i32 to vector<1x128xi32>
    %258 = arith.select %256, %254, %257 : vector<1x128xi1>, vector<1x128xi32>
    %cst_82 = arith.constant dense<-2147483648> : vector<1xi32>
    %259 = vector.multi_reduction <maxsi>, %258, %cst_82 [1] : vector<1x128xi32> to vector<1xi32>
    %260 = vector.shape_cast %259 : vector<1xi32> to vector<1x1xi32>
    %261 = vector.broadcast %260 : vector<1x1xi32> to vector<1x128xi32>
    %262 = arith.cmpi eq, %0, %261 : vector<1x128xi32>
    %263 = arith.extui %262 : vector<1x128xi1> to vector<1x128xi32>
    %264 = tpu.concatenate %263, %253, %243, %233, %223, %213, %203, %192 in 0 : vector<1x128xi32>, vector<1x128xi32>, vector<1x128xi32>, vector<1x128xi32>, vector<1x128xi32>, vector<1x128xi32>, vector<1x128xi32>, vector<1x128xi32> -> vector<8x128xi32>
    %265 = arith.sitofp %264 : vector<8x128xi32> to vector<8x128xf32>
    %c0_83 = arith.constant 0 : index
    %c0_84 = arith.constant 0 : index
    %266 = vector.load %arg4[%c0_83, %c0_84] : memref<8x128xf32, #tpu.memory_space<vmem>>, vector<8x128xf32>
    tpu.vector_store %arg4[%c0_83, %c0_84], %265 {strides = array<i32>} : memref<8x128xf32, #tpu.memory_space<vmem>>, vector<8x128xf32>,
    return
  }
}

</mosaic_0001>

<bundles_post_ra>
// kernel: tpu_custom_call.1
= control target key start
LH: loop header
LB: loop body
LE: loop exit
PB: predicated region body
PF: predicated region fallthrough
CT: control target
= control target key end

     0   :  { %10 = vsyncpa [#allocation4], 0  ;;  %s797_s0 = inlined_call_operand.hbm [shape: f32[8,128], index: 0, kind: input, shape index: {}]   ;;  %s798_s1 = inlined_call_operand.hbm [shape: f32[8,128], index: 1, kind: input, shape index: {}]   ;;  %s799_s2 = inlined_call_operand.vmem [shape: f32[1,128], index: 2, kind: input, shape index: {}]   ;;  %s800_s3 = inlined_call_operand.hbm [shape: f32[1,1], index: 3, kind: output, shape index: {0}]   ;;  %s801_s4 = inlined_call_operand.hbm [shape: f32[8,128], index: 4, kind: output, shape index: {1}]  }
   0x1   :  { %11 = vsyncpa [#allocation7], 0 }
   0x2   :  { %12 = vsyncpa [#allocation5], 0 }
   0x3   :  { %13 = vsyncpa [#allocation10], 0  ;;  %s594_s15 = smov [#allocation3]   ;;  %s595_s17 = smov [#allocation6]  }
   0x4   :  { %s20_s16 = sshll.u32 %s594_s15, 4  ;;  %s30_s18 = sshll.u32 %s595_s17, 4  ;;  %s21_s16 = int_to_ptr.vmem [resolvable:$true] %s20_s16  ;;  %s31_s18 = int_to_ptr.vmem [resolvable:$true] %s30_s18 }
   0x5   :  { %s514_s19 = scalar_lea.vmem %s21_s16, 128  ;;  %p519_p1 = scmp.lt.s32.totalorder %s21_s16, %s21_s16 }
   0x6   :  { %p515_p0 = scmp.ne.s32.totalorder %s21_s16, %s514_s19  ;;  %p520_p2 = scmp.lt.s32.totalorder %s514_s19, %s514_s19 }
   0x8   :  { %p521_p3 = por %p520_p2, %p519_p1 }
   0xa   :  { %p522_p4 = pnand %p521_p3, %p515_p0 }
   0xc   :  { %525 = shalt.err (!%p522_p4)
}
   0xd   :  { %23 = dma.hbm_to_vmem [thread:$0]  %s797_s0, 128, %s21_s16, [#allocation4]  }
   0xe   :  { %s534_s22 = scalar_lea.vmem %s31_s18, 128  ;;  %p539_p6 = scmp.lt.s32.totalorder %s31_s18, %s31_s18 }
   0xf   :  { %p535_p5 = scmp.ne.s32.totalorder %s31_s18, %s534_s22  ;;  %p540_p7 = scmp.lt.s32.totalorder %s534_s22, %s534_s22 }
  0x11   :  { %p541_p8 = por %p540_p7, %p539_p6 }
  0x13   :  { %p542_p9 = pnand %p541_p8, %p535_p5 }
  0x15   :  { %545 = shalt.err (!%p542_p9)
}
  0x16   :  { %33 = dma.hbm_to_vmem [thread:$0]  %s798_s1, 128, %s31_s18, [#allocation7]  }
  0x17   :  { %586 = dma.done.wait [#allocation4], 128  }
  0x18   :  { %587 = vsyncadd [#allocation4], 4294967168  ;;  %v42_v0 = vlaneseq }
  0x19   :  { %588 = dma.done.wait [#allocation7], 128  }
  0x1a   :  { %589 = vsyncadd [#allocation7], 4294967168  ;;  %v631_v1 = vand.u32 127, %v42_v0  ;;  %v633_v2 = vshrl.u32 %v42_v0, 7  ;;  %v596_v4 = vmov -10000.0   ;;  %v645_v8 = vld [vmem:[#allocation6] sm:$0xff] }
  0x1b   :  { %v648_v16 = vld [vmem:[#allocation3] sm:$0xff]  ;;  %vm265_vm10 = vcmask 1040384   ;;  %vm267_vm15 = vcmask 1041408  }
  0x1c   :  { %vm637_vm0 = vcmp.eq.s32.totalorder %v633_v2, %v631_v1  ;;  %vm48_vm1 = vcmp.eq.s32.totalorder %v631_v1, 5  ;;  %vm50_vm2 = vcmp.lt.s32.totalorder %v631_v1, 7  ;;  %v78_v19 = vsub.s32 0, %v633_v2 }
  0x1d   :  { %v49_v5 = vsel %vm48_vm1, 0.0, %v596_v4  ;;  %v105_v36 = vsub.s32 1, %v633_v2  ;;  %v132_v60 = vsub.s32 2, %v633_v2 }
  0x1e   :  { %v51_v6 = vsel %vm50_vm2, %v49_v5, -1e+30 }
  0x1f   :  { %v53_v7 = vsel %vm637_vm0, %v51_v6, -inf }
  0x20   :  { %54 = vmax.xlane.f32.xlu0 %v53_v7 }
  0xa9   :  { %v55_v9 = vpop.xlane.xlu0 %54 }
  0xaa   :  { %v56_v10 = vadd.f32 %v55_v9, %v645_v8 }
  0xac   :  { %v57_v11 = vrot.slane %v56_v10, 4 }
  0xae   :  { %v58_v12 = vmax.f32 %v56_v10, %v57_v11 }
  0xb0   :  { %v59_v13 = vrot.slane %v58_v12, 2 }
  0xb2   :  { %v60_v14 = vmax.f32 %v58_v12, %v59_v13 }
  0xb4   :  { %v61_v15 = vrot.slane %v60_v14, 1 }
  0xb6   :  { %v62_v17 = vmax.f32 %v60_v14, %v61_v15 }
  0xb8   :  { %vm63_vm3 = vcmp.eq.f32.partialorder %v56_v10, %v62_v17  ;;  %v74_v18 = vadd.f32 %v62_v17, %v648_v16 }
  0xb9   :  { %v64_v23 = vsel %vm63_vm3, %v633_v2, 128 }
  0xba   :  { %v75_v20 = vmax.f32 %v74_v18, -1e+30  ;;  %v65_v25 = vrot.slane %v64_v23, 4 }
  0xbc   :  { %v79_v21 = vrot.slane %v75_v20, %v78_v19  ;;  %vm66_vm4 = vcmp.lt.s32.totalorder %v64_v23, %v65_v25 }
  0xbd   :  { %v67_v30 = vsel %vm66_vm4, %v64_v23, %v65_v25 }
  0xbe   :  { %v80_v22 = vsel %vm637_vm0, %v79_v21, -inf  ;;  %v68_v32 = vrot.slane %v67_v30, 2 }
  0xbf   :  { %81 = vmax.xlane.f32.xlu0 %v80_v22  ;;  %v159_v22 = vsub.s32 3, %v633_v2 }
  0xc0   :  { %vm69_vm5 = vcmp.lt.s32.totalorder %v67_v30, %v68_v32 }
  0xc1   :  { %v70_v40 = vsel %vm69_vm5, %v67_v30, %v68_v32  ;;  %vm269_vm5 = vcmask 1042432  }
  0xc2   :  { %v71_v43 = vrot.slane %v70_v40, 1 }
  0xc4   :  { %vm72_vm9 = vcmp.lt.s32.totalorder %v70_v40, %v71_v43 }
  0xc5   :  { %v73_v48 = vsel %vm72_vm9, %v70_v40, %v71_v43  ;;  %v186_v43 = vsub.s32 4, %v633_v2 }
 0x148   :  { %v82_v24 = vpop.xlane.xlu0 %81 }
 0x149   :  { %v83_v26 = vadd.f32 %v82_v24, %v645_v8 }
 0x14b   :  { %v84_v27 = vrot.slane %v83_v26, 4 }
 0x14d   :  { %v85_v28 = vmax.f32 %v83_v26, %v84_v27 }
 0x14f   :  { %v86_v29 = vrot.slane %v85_v28, 2 }
 0x151   :  { %v87_v31 = vmax.f32 %v85_v28, %v86_v29 }
 0x153   :  { %v88_v33 = vrot.slane %v87_v31, 1 }
 0x155   :  { %v89_v34 = vmax.f32 %v87_v31, %v88_v33 }
 0x157   :  { %vm90_vm6 = vcmp.eq.f32.partialorder %v83_v26, %v89_v34  ;;  %v101_v35 = vadd.f32 %v89_v34, %v648_v16 }
 0x158   :  { %v91_v37 = vsel %vm90_vm6, %v633_v2, 128 }
 0x159   :  { %v92_v38 = vrot.slane %v91_v37, 4  ;;  %v102_v39 = vmax.f32 %v101_v35, -1e+30 }
 0x15b   :  { %vm93_vm7 = vcmp.lt.s32.totalorder %v91_v37, %v92_v38  ;;  %v106_v41 = vrot.slane %v102_v39, %v105_v36 }
 0x15c   :  { %v94_v42 = vsel %vm93_vm7, %v91_v37, %v92_v38 }
 0x15d   :  { %v95_v44 = vrot.slane %v94_v42, 2  ;;  %v107_v45 = vsel %vm637_vm0, %v106_v41, -inf }
 0x15e   :  { %108 = vmax.xlane.f32.xlu1 %v107_v45 }
 0x15f   :  { %vm96_vm8 = vcmp.lt.s32.totalorder %v94_v42, %v95_v44 }
 0x160   :  { %v97_v46 = vsel %vm96_vm8, %v94_v42, %v95_v44 }
 0x161   :  { %v98_v47 = vrot.slane %v97_v46, 1 }
 0x163   :  { %vm99_vm11 = vcmp.lt.s32.totalorder %v97_v46, %v98_v47 }
 0x164   :  { %v100_v49 = vsel %vm99_vm11, %v97_v46, %v98_v47  ;;  %vm271_vm11 = vcmask 1043456  }
 0x165   :  { %v266_v50 = vsel %vm265_vm10, %v73_v48, %v100_v49 }
 0x1e7   :  { %v109_v51 = vpop.xlane.xlu1 %108 }
 0x1e8   :  { %v110_v52 = vadd.f32 %v109_v51, %v645_v8 }
 0x1ea   :  { %v111_v53 = vrot.slane %v110_v52, 4 }
 0x1ec   :  { %v112_v54 = vmax.f32 %v110_v52, %v111_v53 }
 0x1ee   :  { %v113_v55 = vrot.slane %v112_v54, 2 }
 0x1f0   :  { %v114_v56 = vmax.f32 %v112_v54, %v113_v55 }
 0x1f2   :  { %v115_v57 = vrot.slane %v114_v56, 1 }
 0x1f4   :  { %v116_v58 = vmax.f32 %v114_v56, %v115_v57 }
 0x1f6   :  { %vm117_vm12 = vcmp.eq.f32.partialorder %v110_v52, %v116_v58  ;;  %v128_v59 = vadd.f32 %v116_v58, %v648_v16 }
 0x1f7   :  { %v118_v61 = vsel %vm117_vm12, %v633_v2, 128 }
 0x1f8   :  { %v119_v62 = vrot.slane %v118_v61, 4  ;;  %v129_v63 = vmax.f32 %v128_v59, -1e+30 }
 0x1fa   :  { %vm120_vm13 = vcmp.lt.s32.totalorder %v118_v61, %v119_v62  ;;  %v133_v0 = vrot.slane %v129_v63, %v132_v60 }
 0x1fb   :  { %v121_v4 = vsel %vm120_vm13, %v118_v61, %v119_v62 }
 0x1fc   :  { %v122_v5 = vrot.slane %v121_v4, 2  ;;  %v134_v6 = vsel %vm637_vm0, %v133_v0, -inf  ;;  %v213_v0 = vsub.s32 5, %v633_v2 }
 0x1fd   :  { %135 = vmax.xlane.f32.xlu1 %v134_v6 }
 0x1fe   :  { %vm123_vm14 = vcmp.lt.s32.totalorder %v121_v4, %v122_v5 }
 0x1ff   :  { %v124_v7 = vsel %vm123_vm14, %v121_v4, %v122_v5 }
 0x200   :  { %v125_v9 = vrot.slane %v124_v7, 1 }
 0x202   :  { %vm126_vm1 = vcmp.lt.s32.totalorder %v124_v7, %v125_v9 }
 0x203   :  { %v127_v10 = vsel %vm126_vm1, %v124_v7, %v125_v9 }
 0x204   :  { %v268_v11 = vsel %vm267_vm15, %v266_v50, %v127_v10 }
 0x286   :  { %v136_v12 = vpop.xlane.xlu1 %135 }
 0x287   :  { %v137_v13 = vadd.f32 %v136_v12, %v645_v8 }
 0x289   :  { %v138_v14 = vrot.slane %v137_v13, 4 }
 0x28b   :  { %v139_v15 = vmax.f32 %v137_v13, %v138_v14 }
 0x28d   :  { %v140_v17 = vrot.slane %v139_v15, 2 }
 0x28f   :  { %v141_v18 = vmax.f32 %v139_v15, %v140_v17 }
 0x291   :  { %v142_v19 = vrot.slane %v141_v18, 1 }
 0x293   :  { %v143_v20 = vmax.f32 %v141_v18, %v142_v19 }
 0x295   :  { %vm144_vm2 = vcmp.eq.f32.partialorder %v137_v13, %v143_v20  ;;  %v155_v21 = vadd.f32 %v143_v20, %v648_v16 }
 0x296   :  { %v145_v23 = vsel %vm144_vm2, %v633_v2, 128  ;;  %vm273_vm2 = vcmask 1044480  }
 0x297   :  { %v146_v24 = vrot.slane %v145_v23, 4  ;;  %v156_v25 = vmax.f32 %v155_v21, -1e+30 }
 0x299   :  { %vm147_vm3 = vcmp.lt.s32.totalorder %v145_v23, %v146_v24  ;;  %v160_v26 = vrot.slane %v156_v25, %v159_v22 }
 0x29a   :  { %v148_v27 = vsel %vm147_vm3, %v145_v23, %v146_v24 }
 0x29b   :  { %v149_v28 = vrot.slane %v148_v27, 2  ;;  %v161_v29 = vsel %vm637_vm0, %v160_v26, -inf  ;;  %v240_v26 = vsub.s32 6, %v633_v2 }
 0x29c   :  { %162 = vmax.xlane.f32.xlu0 %v161_v29 }
 0x29d   :  { %vm150_vm4 = vcmp.lt.s32.totalorder %v148_v27, %v149_v28 }
 0x29e   :  { %v151_v30 = vsel %vm150_vm4, %v148_v27, %v149_v28 }
 0x29f   :  { %v152_v31 = vrot.slane %v151_v30, 1 }
 0x2a1   :  { %vm153_vm6 = vcmp.lt.s32.totalorder %v151_v30, %v152_v31 }
 0x2a2   :  { %v154_v32 = vsel %vm153_vm6, %v151_v30, %v152_v31 }
 0x2a3   :  { %v270_v33 = vsel %vm269_vm5, %v268_v11, %v154_v32 }
 0x325   :  { %v163_v34 = vpop.xlane.xlu0 %162 }
 0x326   :  { %v164_v35 = vadd.f32 %v163_v34, %v645_v8 }
 0x328   :  { %v165_v36 = vrot.slane %v164_v35, 4 }
 0x32a   :  { %v166_v37 = vmax.f32 %v164_v35, %v165_v36 }
 0x32c   :  { %v167_v38 = vrot.slane %v166_v37, 2 }
 0x32e   :  { %v168_v39 = vmax.f32 %v166_v37, %v167_v38 }
 0x330   :  { %v169_v40 = vrot.slane %v168_v39, 1 }
 0x332   :  { %v170_v41 = vmax.f32 %v168_v39, %v169_v40 }
 0x334   :  { %vm171_vm7 = vcmp.eq.f32.partialorder %v164_v35, %v170_v41  ;;  %v182_v42 = vadd.f32 %v170_v41, %v648_v16 }
 0x335   :  { %v172_v44 = vsel %vm171_vm7, %v633_v2, 128 }
 0x336   :  { %v173_v45 = vrot.slane %v172_v44, 4  ;;  %v183_v46 = vmax.f32 %v182_v42, -1e+30 }
 0x338   :  { %vm174_vm8 = vcmp.lt.s32.totalorder %v172_v44, %v173_v45  ;;  %v187_v47 = vrot.slane %v183_v46, %v186_v43 }
 0x339   :  { %v175_v48 = vsel %vm174_vm8, %v172_v44, %v173_v45  ;;  %vm275_vm8 = vcmask 1045504  }
 0x33a   :  { %v176_v49 = vrot.slane %v175_v48, 2  ;;  %v188_v50 = vsel %vm637_vm0, %v187_v47, -inf  ;;  %v499_v47 = vld [vmem:[%s799_s2] ss:$0 sm:$0xff]  ;;  %s597_s2 = smov [#allocation8]  }
 0x33b   :  { %189 = vmax.xlane.f32.xlu1 %v188_v50  ;;  %s475_s25 = sshll.u32 %s597_s2, 4  ;;  %s476_s25 = int_to_ptr.vmem [resolvable:$true] %s475_s25 }
 0x33c   :  { %vm177_vm9 = vcmp.lt.s32.totalorder %v175_v48, %v176_v49  ;;  %s546_s26 = scalar_lea.vmem %s476_s25, 16  ;;  %s550_s27 = scalar_lea.vmem %s476_s25, 32 }
 0x33d   :  { %v178_v51 = vsel %vm177_vm9, %v175_v48, %v176_v49  ;;  %p547_p10 = scmp.ne.s32.totalorder %s476_s25, %s546_s26  ;;  %p551_p11 = scmp.lt.s32.totalorder %s476_s25, %s476_s25 }
 0x33e   :  { %v179_v52 = vrot.slane %v178_v51, 1  ;;  %p552_p12 = scmp.lt.s32.totalorder %s550_s27, %s546_s26 }
 0x340   :  { %vm180_vm12 = vcmp.lt.s32.totalorder %v178_v51, %v179_v52  ;;  %p553_p13 = por %p552_p12, %p551_p11 }
 0x341   :  { %v181_v53 = vsel %vm180_vm12, %v178_v51, %v179_v52 }
 0x342   :  { %v272_v54 = vsel %vm271_vm11, %v270_v33, %v181_v53  ;;  %p554_p0 = pnand %p553_p13, %p547_p10 }
 0x3c4   :  { %v190_v55 = vpop.xlane.xlu1 %189 }
 0x3c5   :  { %v191_v56 = vadd.f32 %v190_v55, %v645_v8 }
 0x3c7   :  { %v192_v57 = vrot.slane %v191_v56, 4 }
 0x3c9   :  { %v193_v58 = vmax.f32 %v191_v56, %v192_v57 }
 0x3cb   :  { %v194_v59 = vrot.slane %v193_v58, 2 }
 0x3cd   :  { %v195_v60 = vmax.f32 %v193_v58, %v194_v59 }
 0x3cf   :  { %v196_v61 = vrot.slane %v195_v60, 1 }
 0x3d1   :  { %v197_v62 = vmax.f32 %v195_v60, %v196_v61 }
 0x3d3   :  { %vm198_vm13 = vcmp.eq.f32.partialorder %v191_v56, %v197_v62  ;;  %v209_v63 = vadd.f32 %v197_v62, %v648_v16 }
 0x3d4   :  { %v199_v4 = vsel %vm198_vm13, %v633_v2, 128 }
 0x3d5   :  { %v200_v5 = vrot.slane %v199_v4, 4  ;;  %v210_v6 = vmax.f32 %v209_v63, -1e+30 }
 0x3d7   :  { %vm201_vm14 = vcmp.lt.s32.totalorder %v199_v4, %v200_v5  ;;  %v214_v7 = vrot.slane %v210_v6, %v213_v0 }
 0x3d8   :  { %v202_v9 = vsel %vm201_vm14, %v199_v4, %v200_v5 }
 0x3d9   :  { %v203_v10 = vrot.slane %v202_v9, 2  ;;  %v215_v11 = vsel %vm637_vm0, %v214_v7, -inf }
 0x3da   :  { %216 = vmax.xlane.f32.xlu0 %v215_v11 }
 0x3db   :  { %vm204_vm1 = vcmp.lt.s32.totalorder %v202_v9, %v203_v10 }
 0x3dc   :  { %v205_v12 = vsel %vm204_vm1, %v202_v9, %v203_v10  ;;  %vm277_vm1 = vcmask 1046528  }
 0x3dd   :  { %v206_v13 = vrot.slane %v205_v12, 1 }
 0x3df   :  { %vm207_vm3 = vcmp.lt.s32.totalorder %v205_v12, %v206_v13 }
 0x3e0   :  { %v208_v14 = vsel %vm207_vm3, %v205_v12, %v206_v13 }
 0x3e1   :  { %v274_v15 = vsel %vm273_vm2, %v272_v54, %v208_v14 }
 0x463   :  { %v217_v17 = vpop.xlane.xlu0 %216 }
 0x464   :  { %v218_v18 = vadd.f32 %v217_v17, %v645_v8 }
 0x466   :  { %v219_v19 = vrot.slane %v218_v18, 4 }
 0x468   :  { %v220_v20 = vmax.f32 %v218_v18, %v219_v19 }
 0x46a   :  { %v221_v21 = vrot.slane %v220_v20, 2 }
 0x46c   :  { %v222_v22 = vmax.f32 %v220_v20, %v221_v21 }
 0x46e   :  { %v223_v23 = vrot.slane %v222_v22, 1 }
 0x470   :  { %v224_v24 = vmax.f32 %v222_v22, %v223_v23 }
 0x472   :  { %vm225_vm4 = vcmp.eq.f32.partialorder %v218_v18, %v224_v24  ;;  %v236_v25 = vadd.f32 %v224_v24, %v648_v16 }
 0x473   :  { %v226_v27 = vsel %vm225_vm4, %v633_v2, 128  ;;  %vm309_vm4 = vcmask 7175  }
 0x474   :  { %v227_v28 = vrot.slane %v226_v27, 4  ;;  %v237_v29 = vmax.f32 %v236_v25, -1e+30 }
 0x476   :  { %vm228_vm6 = vcmp.lt.s32.totalorder %v226_v27, %v227_v28  ;;  %v241_v30 = vrot.slane %v237_v29, %v240_v26 }
 0x477   :  { %v229_v31 = vsel %vm228_vm6, %v226_v27, %v227_v28 }
 0x478   :  { %v230_v32 = vrot.slane %v229_v31, 2  ;;  %v242_v33 = vsel %vm637_vm0, %v241_v30, -inf  ;;  %vm288_vm0 = vcmask 1047559  }
 0x479   :  { %243 = vmax.xlane.f32.xlu1 %v242_v33 }
 0x47a   :  { %vm231_vm7 = vcmp.lt.s32.totalorder %v229_v31, %v230_v32 }
 0x47b   :  { %v232_v34 = vsel %vm231_vm7, %v229_v31, %v230_v32 }
 0x47c   :  { %v233_v35 = vrot.slane %v232_v34, 1 }
 0x47e   :  { %vm234_vm9 = vcmp.lt.s32.totalorder %v232_v34, %v233_v35 }
 0x47f   :  { %v235_v36 = vsel %vm234_vm9, %v232_v34, %v233_v35 }
 0x480   :  { %v276_v37 = vsel %vm275_vm8, %v274_v15, %v235_v36 }
 0x502   :  { %v244_v38 = vpop.xlane.xlu1 %243 }
 0x503   :  { %v245_v39 = vadd.f32 %v244_v38, %v645_v8 }
 0x505   :  { %v246_v40 = vrot.slane %v245_v39, 4 }
 0x507   :  { %v247_v41 = vmax.f32 %v245_v39, %v246_v40 }
 0x509   :  { %v248_v42 = vrot.slane %v247_v41, 2 }
 0x50b   :  { %v249_v43 = vmax.f32 %v247_v41, %v248_v42 }
 0x50d   :  { %v250_v44 = vrot.slane %v249_v43, 1 }
 0x50f   :  { %v251_v45 = vmax.f32 %v249_v43, %v250_v44 }
 0x511   :  { %vm252_vm12 = vcmp.eq.f32.partialorder %v245_v39, %v251_v45  ;;  %v263_v3 = vadd.f32 %v251_v45, %v648_v16 }
 0x512   :  { %v253_v46 = vsel %vm252_vm12, %v633_v2, 128 }
 0x513   :  { %v254_v48 = vrot.slane %v253_v46, 4  ;;  %v264_v49 = vmax.f32 %v263_v3, -1e+30 }
 0x515   :  { %vm255_vm13 = vcmp.lt.s32.totalorder %v253_v46, %v254_v48  ;;  %v287_v8 = vadd.f32 %v499_v47, %v264_v49 }
 0x516   :  { %v256_v50 = vsel %vm255_vm13, %v253_v46, %v254_v48 }
 0x517   :  { %v257_v51 = vrot.slane %v256_v50, 2  ;;  %v289_v52 = vsel %vm288_vm0, %v287_v8, -inf }
 0x518   :  { %290 = vmax.xlane.f32.xlu0 %v289_v52 }
 0x519   :  { %vm258_vm14 = vcmp.lt.s32.totalorder %v256_v50, %v257_v51 }
 0x51a   :  { %v259_v53 = vsel %vm258_vm14, %v256_v50, %v257_v51 }
 0x51b   :  { %v260_v54 = vrot.slane %v259_v53, 1 }
 0x51d   :  { %vm261_vm3 = vcmp.lt.s32.totalorder %v259_v53, %v260_v54 }
 0x51e   :  { %v262_v2 = vsel %vm261_vm3, %v259_v53, %v260_v54 }
 0x51f   :  { %v705_v16 = vsel %vm277_vm1, %v276_v37, %v262_v2 }
 0x520   :  { %v334_v23 = vrot.slane %v705_v16, 7  ;;  %v354_v37 = vrot.slane %v705_v16, 6 }
 0x5a1   :  { %v291_v55 = vpop.xlane.xlu0 %290 }
 0x5a2   :  { %vm292_vm6 = vcmp.eq.f32.partialorder %v287_v8, %v291_v55  ;;  %310 = vst.msk [vmem:[#allocation8 - $0x7] sm:$0x80] %vm309_vm4, %v291_v55  ;;  %v374_v8 = vrot.slane %v705_v16, 5 }
 0x5a3   :  { %v293_v56 = vsel %vm292_vm6, %v631_v1, 128 }
 0x5a4   :  { %v294_v57 = vsel %vm288_vm0, %v293_v56, 2147483647 }
 0x5a5   :  { %v296_v58 = vshra.s32 %v294_v57, 16  ;;  %v295_v60 = vand.u32 65535, %v294_v57 }
 0x5a7   :  { %v298_v59 = vcvt.s32.f32 %v296_v58  ;;  %v297_v62 = vcvt.s32.f32 %v295_v60 }
 0x5a9   :  { %299 = vmin.xlane.f32.xlu1 %v298_v59 }
 0x632   :  { %v300_v61 = vpop.xlane.xlu1 %299 }
 0x633   :  { %vm301_vm7 = vcmp.eq.f32.partialorder %v298_v59, %v300_v61  ;;  %v306_v0 = vcvt.f32.s32 %v300_v61 }
 0x634   :  { %v302_v63 = vsel %vm301_vm7, %v297_v62, inf  ;;  %v394_v62 = vrot.slane %v705_v16, 4 }
 0x635   :  { %303 = vmin.xlane.f32.xlu0 %v302_v63  ;;  %v307_v5 = vshll.u32 %v306_v0, 16 }
 0x6be   :  { %v304_v4 = vpop.xlane.xlu0 %303 }
 0x6bf   :  { %v305_v6 = vcvt.f32.s32 %v304_v4 }
 0x6c1   :  { %v709_v7 = vadd.s32 %v307_v5, %v305_v6 }
 0x6c3   :  { %vm311_vm9 = vcmp.eq.s32.totalorder %v631_v1, %v709_v7 }
 0x6c4   :  { %v315_v9 = vsel %vm311_vm9, %v705_v16, 0 }
 0x6c5   :  { %v316_v10 = vsel %vm288_vm0, %v315_v9, 2147483648 }
 0x6c6   :  { %v318_v11 = vshra.s32 %v316_v10, 16  ;;  %v317_v13 = vand.u32 65535, %v316_v10 }
 0x6c8   :  { %v320_v12 = vcvt.s32.f32 %v318_v11  ;;  %v319_v15 = vcvt.s32.f32 %v317_v13 }
 0x6ca   :  { %321 = vmax.xlane.f32.xlu1 %v320_v12 }
 0x753   :  { %v322_v14 = vpop.xlane.xlu1 %321 }
 0x754   :  { %vm323_vm12 = vcmp.eq.f32.partialorder %v320_v12, %v322_v14  ;;  %v328_v18 = vcvt.f32.s32 %v322_v14 }
 0x755   :  { %v324_v17 = vsel %vm323_vm12, %v319_v15, -inf }
 0x756   :  { %325 = vmax.xlane.f32.xlu0 %v324_v17  ;;  %v329_v20 = vshll.u32 %v328_v18, 16  ;;  %v414_v18 = vrot.slane %v705_v16, 3 }
 0x7df   :  { %v326_v19 = vpop.xlane.xlu0 %325 }
 0x7e0   :  { %v327_v21 = vcvt.f32.s32 %v326_v19 }
 0x7e2   :  { %v718_v22 = vadd.s32 %v329_v20, %v327_v21 }
 0x7e4   :  { %vm331_vm13 = vcmp.eq.s32.totalorder %v631_v1, %v718_v22 }
 0x7e5   :  { %v335_v24 = vsel %vm331_vm13, %v334_v23, 0 }
 0x7e6   :  { %v336_v25 = vsel %vm288_vm0, %v335_v24, 2147483648 }
 0x7e7   :  { %v338_v26 = vshra.s32 %v336_v25, 16  ;;  %v337_v28 = vand.u32 65535, %v336_v25 }
 0x7e9   :  { %v340_v27 = vcvt.s32.f32 %v338_v26  ;;  %v339_v30 = vcvt.s32.f32 %v337_v28 }
 0x7eb   :  { %341 = vmax.xlane.f32.xlu1 %v340_v27 }
 0x874   :  { %v342_v29 = vpop.xlane.xlu1 %341 }
 0x875   :  { %vm343_vm14 = vcmp.eq.f32.partialorder %v340_v27, %v342_v29  ;;  %v348_v32 = vcvt.f32.s32 %v342_v29 }
 0x876   :  { %v344_v31 = vsel %vm343_vm14, %v339_v30, -inf }
 0x877   :  { %345 = vmax.xlane.f32.xlu0 %v344_v31  ;;  %v349_v34 = vshll.u32 %v348_v32, 16 }
 0x900   :  { %v346_v33 = vpop.xlane.xlu0 %345 }
 0x901   :  { %v347_v35 = vcvt.f32.s32 %v346_v33  ;;  %v434_v33 = vrot.slane %v705_v16, 2 }
 0x903   :  { %v727_v36 = vadd.s32 %v349_v34, %v347_v35 }
 0x905   :  { %vm351_vm3 = vcmp.eq.s32.totalorder %v631_v1, %v727_v36 }
 0x906   :  { %v355_v38 = vsel %vm351_vm3, %v354_v37, 0 }
 0x907   :  { %v356_v39 = vsel %vm288_vm0, %v355_v38, 2147483648 }
 0x908   :  { %v358_v40 = vshra.s32 %v356_v39, 16  ;;  %v357_v42 = vand.u32 65535, %v356_v39 }
 0x90a   :  { %v360_v41 = vcvt.s32.f32 %v358_v40  ;;  %v359_v44 = vcvt.s32.f32 %v357_v42 }
 0x90c   :  { %361 = vmax.xlane.f32.xlu1 %v360_v41 }
 0x995   :  { %v362_v43 = vpop.xlane.xlu1 %361 }
 0x996   :  { %vm363_vm4 = vcmp.eq.f32.partialorder %v360_v41, %v362_v43  ;;  %v368_v3 = vcvt.f32.s32 %v362_v43 }
 0x997   :  { %v364_v45 = vsel %vm363_vm4, %v359_v44, -inf }
 0x998   :  { %365 = vmax.xlane.f32.xlu0 %v364_v45  ;;  %v369_v47 = vshll.u32 %v368_v3, 16 }
 0xa21   :  { %v366_v46 = vpop.xlane.xlu0 %365 }
 0xa22   :  { %v367_v48 = vcvt.f32.s32 %v366_v46 }
 0xa24   :  { %v736_v49 = vadd.s32 %v369_v47, %v367_v48 }
 0xa26   :  { %vm371_vm6 = vcmp.eq.s32.totalorder %v631_v1, %v736_v49 }
 0xa27   :  { %v375_v50 = vsel %vm371_vm6, %v374_v8, 0 }
 0xa28   :  { %v376_v51 = vsel %vm288_vm0, %v375_v50, 2147483648 }
 0xa29   :  { %v378_v52 = vshra.s32 %v376_v51, 16  ;;  %v377_v54 = vand.u32 65535, %v376_v51 }
 0xa2b   :  { %v380_v53 = vcvt.s32.f32 %v378_v52  ;;  %v379_v55 = vcvt.s32.f32 %v377_v54 }
 0xa2d   :  { %381 = vmax.xlane.f32.xlu1 %v380_v53 }
 0xab6   :  { %v382_v2 = vpop.xlane.xlu1 %381 }
 0xab7   :  { %vm383_vm7 = vcmp.eq.f32.partialorder %v380_v53, %v382_v2  ;;  %v388_v57 = vcvt.f32.s32 %v382_v2 }
 0xab8   :  { %v384_v56 = vsel %vm383_vm7, %v379_v55, -inf }
 0xab9   :  { %385 = vmax.xlane.f32.xlu0 %v384_v56  ;;  %v389_v59 = vshll.u32 %v388_v57, 16 }
 0xb42   :  { %v386_v58 = vpop.xlane.xlu0 %385 }
 0xb43   :  { %v387_v60 = vcvt.f32.s32 %v386_v58 }
 0xb45   :  { %v745_v61 = vadd.s32 %v389_v59, %v387_v60 }
 0xb47   :  { %vm391_vm12 = vcmp.eq.s32.totalorder %v631_v1, %v745_v61 }
 0xb48   :  { %v395_v63 = vsel %vm391_vm12, %v394_v62, 0 }
 0xb49   :  { %v396_v0 = vsel %vm288_vm0, %v395_v63, 2147483648 }
 0xb4a   :  { %v398_v4 = vshra.s32 %v396_v0, 16  ;;  %v397_v6 = vand.u32 65535, %v396_v0 }
 0xb4c   :  { %v400_v5 = vcvt.s32.f32 %v398_v4  ;;  %v399_v10 = vcvt.s32.f32 %v397_v6 }
 0xb4e   :  { %401 = vmax.xlane.f32.xlu1 %v400_v5 }
 0xbd7   :  { %v402_v9 = vpop.xlane.xlu1 %401 }
 0xbd8   :  { %vm403_vm14 = vcmp.eq.f32.partialorder %v400_v5, %v402_v9  ;;  %v408_v12 = vcvt.f32.s32 %v402_v9 }
 0xbd9   :  { %v404_v11 = vsel %vm403_vm14, %v399_v10, -inf }
 0xbda   :  { %405 = vmax.xlane.f32.xlu0 %v404_v11  ;;  %v409_v14 = vshll.u32 %v408_v12, 16 }
 0xc63   :  { %v406_v13 = vpop.xlane.xlu0 %405 }
 0xc64   :  { %v407_v15 = vcvt.f32.s32 %v406_v13 }
 0xc66   :  { %v410_v17 = vadd.s32 %v409_v14, %v407_v15 }
 0xc68   :  { %vm411_vm4 = vcmp.eq.s32.totalorder %v631_v1, %v410_v17 }
 0xc69   :  { %v415_v19 = vsel %vm411_vm4, %v414_v18, 0 }
 0xc6a   :  { %v416_v20 = vsel %vm288_vm0, %v415_v19, 2147483648 }
 0xc6b   :  { %v418_v21 = vshra.s32 %v416_v20, 16  ;;  %v417_v24 = vand.u32 65535, %v416_v20 }
 0xc6d   :  { %v420_v23 = vcvt.s32.f32 %v418_v21  ;;  %v419_v26 = vcvt.s32.f32 %v417_v24 }
 0xc6f   :  { %421 = vmax.xlane.f32.xlu1 %v420_v23 }
 0xcf8   :  { %v422_v25 = vpop.xlane.xlu1 %421 }
 0xcf9   :  { %vm423_vm7 = vcmp.eq.f32.partialorder %v420_v23, %v422_v25  ;;  %v428_v28 = vcvt.f32.s32 %v422_v25 }
 0xcfa   :  { %v424_v27 = vsel %vm423_vm7, %v419_v26, -inf }
 0xcfb   :  { %425 = vmax.xlane.f32.xlu0 %v424_v27  ;;  %v429_v30 = vshll.u32 %v428_v28, 16 }
 0xd84   :  { %v426_v29 = vpop.xlane.xlu0 %425 }
 0xd85   :  { %v427_v31 = vcvt.f32.s32 %v426_v29 }
 0xd87   :  { %v430_v32 = vadd.s32 %v429_v30, %v427_v31 }
 0xd89   :  { %vm431_vm14 = vcmp.eq.s32.totalorder %v631_v1, %v430_v32 }
 0xd8a   :  { %v435_v34 = vsel %vm431_vm14, %v434_v33, 0 }
 0xd8b   :  { %v436_v35 = vsel %vm288_vm0, %v435_v34, 2147483648 }
 0xd8c   :  { %v438_v37 = vshra.s32 %v436_v35, 16  ;;  %v437_v39 = vand.u32 65535, %v436_v35 }
 0xd8e   :  { %v440_v38 = vcvt.s32.f32 %v438_v37  ;;  %v439_v41 = vcvt.s32.f32 %v437_v39 }
 0xd90   :  { %441 = vmax.xlane.f32.xlu1 %v440_v38 }
 0xe19   :  { %v442_v40 = vpop.xlane.xlu1 %441 }
 0xe1a   :  { %vm443_vm7 = vcmp.eq.f32.partialorder %v440_v38, %v442_v40 }
 0xe1b   :  { %v444_v42 = vsel %vm443_vm7, %v439_v41, -inf }
 0xe1c   :  { %445 = vmax.xlane.f32.xlu0 %v444_v42 }
 0xe1d   :  { %557 = shalt.err (!%p554_p0)
}
 0xe1e   :  { %478 = dma.vmem_to_hbm [thread:$0]  %s476_s25, 16, %s800_s3, [#allocation5]   ;;  %v448_v16 = vcvt.f32.s32 %v442_v40  ;;  %v598_v46 = vmov 0  }
 0xe1f   :  { %v432_v47 = vsel %vm431_vm14, 1, %v598_v46  ;;  %v412_v48 = vsel %vm411_vm4, 1, %v598_v46  ;;  %v392_v8 = vsel %vm391_vm12, 1, %v598_v46  ;;  %v372_v51 = vsel %vm371_vm6, 1, %v598_v46  ;;  %s599_s3 = smov [#allocation9]  }
 0xe20   :  { %v449_v44 = vshll.u32 %v448_v16, 16  ;;  %v454_v52 = vrot.slane %v432_v47, 6  ;;  %v352_v54 = vsel %vm351_vm3, 1, %v598_v46  ;;  %v455_v2 = vrot.slane %v412_v48, 5  ;;  %s485_s30 = sshll.u32 %s599_s3, 4  ;;  %s486_s30 = int_to_ptr.vmem [resolvable:$true] %s485_s30 }
 0xe21   :  { %v332_v55 = vsel %vm331_vm13, 1, %v598_v46  ;;  %v456_v56 = vrot.slane %v392_v8, 4  ;;  %v457_v58 = vrot.slane %v372_v51, 3  ;;  %v458_v60 = vrot.slane %v352_v54, 2  ;;  %s566_s5 = scalar_lea.vmem %s486_s30, 128  ;;  %p571_p2 = scmp.lt.s32.totalorder %s486_s30, %s486_s30 }
 0xe22   :  { %v459_v61 = vrot.slane %v332_v55, 1  ;;  %v312_v22 = vsel %vm311_vm9, 1, %v598_v46  ;;  %p567_p1 = scmp.ne.s32.totalorder %s486_s30, %s566_s5  ;;  %p572_p3 = scmp.lt.s32.totalorder %s566_s5, %s566_s5 }
 0xe24   :  { %p573_p4 = por %p572_p3, %p571_p2 }
 0xe26   :  { %p574_p5 = pnand %p573_p4, %p567_p1 }
 0xea5   :  { %v446_v43 = vpop.xlane.xlu0 %445 }
 0xea6   :  { %v447_v45 = vcvt.f32.s32 %v446_v43 }
 0xea8   :  { %v450_v3 = vadd.s32 %v449_v44, %v447_v45 }
 0xeaa   :  { %vm451_vm0 = vcmp.eq.s32.totalorder %v631_v1, %v450_v3 }
 0xeab   :  { %v452_v50 = vsel %vm451_vm0, 1, %v598_v46 }
 0xeac   :  { %v453_v53 = vrot.slane %v452_v50, 7 }
 0xeae   :  { %v460_v57 = vsel %vm265_vm10, %v453_v53, %v454_v52 }
 0xeaf   :  { %v461_v59 = vsel %vm267_vm15, %v460_v57, %v455_v2 }
 0xeb0   :  { %v462_v49 = vsel %vm269_vm5, %v461_v59, %v456_v56 }
 0xeb1   :  { %v463_v62 = vsel %vm271_vm11, %v462_v49, %v457_v58 }
 0xeb2   :  { %v464_v36 = vsel %vm273_vm2, %v463_v62, %v458_v60 }
 0xeb3   :  { %v465_v63 = vsel %vm275_vm8, %v464_v36, %v459_v61 }
 0xeb4   :  { %v466_v0 = vsel %vm277_vm1, %v465_v63, %v312_v22 }
 0xeb5   :  { %v467_v4 = vcvt.s32.f32 %v466_v0 }
 0xeb7   :  { %468 = vst [vmem:[#allocation9] sm:$0xff] %v467_v4 }
 0xeb8   :  { %577 = shalt.err (!%p574_p5)
}
 0xeb9   :  { %488 = dma.vmem_to_hbm [thread:$0]  %s486_s30, 128, %s801_s4, [#allocation10]  }
 0xeba   :  { %590 = dma.done.wait [#allocation5], 16  }
 0xebb   :  { %591 = vsyncadd [#allocation5], 4294967280 }
 0xebc   :  { %592 = dma.done.wait [#allocation10], 128  }
 0xebd   :  { %593 = vsyncadd [#allocation10], 4294967168 }
 0xebe   :  { %495 = vsyncpa [#allocation4], 1 }
 0xebf   :  { %496 = vsyncpa [#allocation7], 1 }
 0xec0   :  { %497 = vsyncpa [#allocation5], 1 }
 0xec1   :  { %498 = vsyncpa [#allocation10], 1 }

</bundles_post_ra>
